<compile_context>
chip_gen: v7x
topology: tpu7x:2x2x1
jax: 0.10.0
libtpu: 0.0.40
codegen_flags: <defaults>
</compile_context>

<pallas_src>
import math
from functools import partial

import jax
import jax.numpy as jnp
from jax import lax
from jax.experimental import pallas as pl
from jax.experimental.pallas import tpu as pltpu


def _round_up(x, n):
    return ((x + n - 1) // n) * n


# ----------------------------------------------------------------------------
# Pallas kernel: one cell step over one batch tile
# ----------------------------------------------------------------------------
def _cell_kernel(inv_scale, dh_pad, m,
                 x_ref, H_ref, w_in_ref, b_in_ref, w_kv_ref, b_kv_ref,
                 w_bl_ref, b_bl_ref, h_ref, y_ref):
    f32 = jnp.float32

    # q = W_in(x): one dense (Bt, Din) @ (Din, Dh) bf16 matmul, f32 accumulate.
    q = jnp.dot(x_ref[...], w_in_ref[...], preferred_element_type=f32) + b_in_ref[...]

    w_kv = w_kv_ref[...]
    b_kv = b_kv_ref[...]

    # Fused K|V projection per backward hop; attention scores on the VPU/XLU
    # (the query length is 1, so a per-hop MXU matmul would waste the array).
    scores = []
    values = []
    for j in range(m):                                    # m is small & static
        kv_j = jnp.dot(H_ref[j], w_kv, preferred_element_type=f32) + b_kv
        k_j = kv_j[:, :dh_pad]
        values.append(kv_j[:, dh_pad:])
        scores.append(jnp.sum(q * k_j, axis=-1, keepdims=True) * inv_scale)

    # numerically stable softmax over the m hops, all in f32.
    s_max = scores[0]
    for j in range(1, m):
        s_max = jnp.maximum(s_max, scores[j])
    p = [jnp.exp(sj - s_max) for sj in scores]
    denom = p[0]
    for j in range(1, m):
        denom = denom + p[j]
    inv_denom = pl.reciprocal(denom, approx=True)         # EUP slot, ~free

    rs = (p[0] * inv_denom) * values[0]
    for j in range(1, m):
        rs = rs + (p[j] * inv_denom) * values[j]

    h = jax.nn.sigmoid(q + rs)
    y = jax.nn.sigmoid(
        jnp.dot(h.astype(jnp.bfloat16), w_bl_ref[...], preferred_element_type=f32)
        + b_bl_ref[...] + h)

    h_ref[...] = h
    y_ref[...] = y


def _cell_pallas(x_p, H_p, kp, inv_scale, *, dh_pad, tile_b):
    b_pad, din_pad = x_p.shape
    m = H_p.shape[0]
    grid = (b_pad // tile_b,)

    # VMEM budget: resident weights + double-buffered activation blocks +
    # live f32 intermediates.  Clamped so it also fits v7x's 64 MiB VMEM.
    weight_bytes = (din_pad * dh_pad + 3 * dh_pad * dh_pad) * 2 + 4 * dh_pad * 4
    block_bytes = (tile_b * din_pad + m * tile_b * dh_pad) * 2 \
        + 2 * tile_b * dh_pad * 4
    live_bytes = (m + 8) * tile_b * dh_pad * 4
    vmem_limit = int(min(max(weight_bytes + 2 * block_bytes + live_bytes + (4 << 20),
                             16 << 20), 64 << 20))

    in_specs = [
        pl.BlockSpec((tile_b, din_pad), lambda i: (i, 0)),        # x tile
        pl.BlockSpec((m, tile_b, dh_pad), lambda i: (0, i, 0)),   # H (m hops)
        pl.BlockSpec((din_pad, dh_pad), lambda i: (0, 0)),        # W_in (resident)
        pl.BlockSpec((1, dh_pad), lambda i: (0, 0)),              # b_in
        pl.BlockSpec((dh_pad, 2 * dh_pad), lambda i: (0, 0)),     # W_k|W_v fused
        pl.BlockSpec((1, 2 * dh_pad), lambda i: (0, 0)),          # b_k|b_v
        pl.BlockSpec((dh_pad, dh_pad), lambda i: (0, 0)),         # W_between
        pl.BlockSpec((1, dh_pad), lambda i: (0, 0)),              # b_between
    ]
    out_specs = (pl.BlockSpec((tile_b, dh_pad), lambda i: (i, 0)),
                 pl.BlockSpec((tile_b, dh_pad), lambda i: (i, 0)))

    return pl.pallas_call(
        partial(_cell_kernel, inv_scale, dh_pad, m),
        out_shape=(jax.ShapeDtypeStruct((b_pad, dh_pad), jnp.float32),
                   jax.ShapeDtypeStruct((b_pad, dh_pad), jnp.float32)),
        grid=grid,
        in_specs=in_specs,
        out_specs=out_specs,
        compiler_params=pltpu.CompilerParams(
            dimension_semantics=("parallel",),          # megacore on v7x
            vmem_limit_bytes=vmem_limit),
    )(x_p, H_p, kp['w_in'], kp['b_in'], kp['w_kv'], kp['b_kv'],
      kp['w_bl'], kp['b_bl'])


# ----------------------------------------------------------------------------
# Jitted step: gather history -> pad -> kernel -> in-place history write-back
# ----------------------------------------------------------------------------
@partial(jax.jit, static_argnames=("hidden_dim", "m"),
         donate_argnames=("h_history",))
def _forward_step(kernel_params, h_history, x, idx, backward_jumps, *,
                  hidden_dim, m):
    B, input_dim = x.shape
    din_pad = _round_up(input_dim, 128)
    dh_pad = _round_up(hidden_dim, 128)
    tile_b = min(256, _round_up(B, 8))
    b_pad = _round_up(B, tile_b)
    inv_scale = 1.0 / math.sqrt(float(hidden_dim))

    # Gather the m backward "jumps" of history.
    # TODO(synk): the torch code clamps negative hops but then indexes with the
    # un-clamped (wrap-around) values; we implement the clamped intent.
    hop = jnp.maximum(idx - backward_jumps, 0)             # (m,)
    H = jnp.transpose(h_history[:B, hop, :], (1, 0, 2))    # (m, B, hidden)

    # Pad to lane-dense kernel shapes, bf16 for the MXU operands.
    x_p = jnp.zeros((b_pad, din_pad), jnp.bfloat16
                    ).at[:B, :input_dim].set(x.astype(jnp.bfloat16))
    H_p = jnp.zeros((m, b_pad, dh_pad), jnp.bfloat16
                    ).at[:, :B, :hidden_dim].set(H.astype(jnp.bfloat16))

    h_pad, y_pad = _cell_pallas(x_p, H_p, kernel_params, inv_scale,
                                dh_pad=dh_pad, tile_b=tile_b)
    h = h_pad[:B, :hidden_dim]
    y = y_pad[:B, :hidden_dim]

    # In-place (donated buffer) history write-back: O(B*Dh), not a full copy.
    zero = jnp.zeros((), dtype=idx.dtype)
    h_history = lax.dynamic_update_slice(h_history, h[:, None, :],
                                         (zero, idx, zero))
    return h_history, h, y


# ----------------------------------------------------------------------------
# Module wrapper (stateful glue in plain JAX)
# ----------------------------------------------------------------------------
class BinaryJumpingRNNCellPallas:
    def __init__(self, params, key):
        self.input_dim = int(params['input_dim'])
        self.hidden_dim = int(params['hidden_dim'])
        self.m = int(params['m'])
        self.r = int(params['r'])
        # h_history: (max_batch, T, hidden); slot 0 is the zero initial state.
        self.h_history = params['h_history'].astype(jnp.float32).at[:, 0].set(0.0)

        jumps, cur = [], 1
        for _ in range(self.m):
            jumps.append(cur)
            cur *= self.r
        self.backward_jumps = jnp.array(jumps, dtype=jnp.int32)

        self.current_calculating_index = 1
        self.scale_factor = float(math.sqrt(float(self.hidden_dim)))

        # torch.nn.Linear-style deterministic init: U(-1/sqrt(fan_in), +)
        ks = jax.random.split(key, 8)

        def linear(kw, kb, fan_in, fan_out):
            lim = 1.0 / math.sqrt(fan_in)
            w = jax.random.uniform(kw, (fan_in, fan_out), jnp.float32, -lim, lim)
            b = jax.random.uniform(kb, (fan_out,), jnp.float32, -lim, lim)
            return w, b

        self.w_in, self.b_in = linear(ks[0], ks[1], self.input_dim, self.hidden_dim)
        self.w_k, self.b_k = linear(ks[2], ks[3], self.hidden_dim, self.hidden_dim)
        self.w_v, self.b_v = linear(ks[4], ks[5], self.hidden_dim, self.hidden_dim)
        self.w_bl, self.b_bl = linear(ks[6], ks[7], self.hidden_dim, self.hidden_dim)

        # Pre-padded, bf16 kernel weights (zero padding keeps padded lanes inert).
        din_pad = _round_up(self.input_dim, 128)
        dh_pad = _round_up(self.hidden_dim, 128)

        def pad2(w, r, c):
            return jnp.zeros((r, c), jnp.float32).at[:w.shape[0], :w.shape[1]].set(w)

        self.kernel_params = {
            'w_in': pad2(self.w_in, din_pad, dh_pad).astype(jnp.bfloat16),
            'b_in': pad2(self.b_in[None, :], 1, dh_pad),
            'w_kv': jnp.concatenate(
                [pad2(self.w_k, dh_pad, dh_pad), pad2(self.w_v, dh_pad, dh_pad)],
                axis=1).astype(jnp.bfloat16),
            'b_kv': jnp.concatenate(
                [pad2(self.b_k[None, :], 1, dh_pad),
                 pad2(self.b_v[None, :], 1, dh_pad)], axis=1),
            'w_bl': pad2(self.w_bl, dh_pad, dh_pad).astype(jnp.bfloat16),
            'b_bl': pad2(self.b_bl[None, :], 1, dh_pad),
        }

    def gather_history(self, batch_size):
        hop = jnp.maximum(self.current_calculating_index - self.backward_jumps, 0)
        return self.h_history[:batch_size, hop, :]          # (B, m, hidden)

    def forward(self, x):
        # History doubling (rare; recompiles only when the shape changes).
        if self.current_calculating_index == self.h_history.shape[1]:
            self.h_history = jnp.concatenate([self.h_history, self.h_history], axis=1)
        idx = jnp.asarray(self.current_calculating_index, jnp.int32)
        # TODO(synk): fusing many timesteps into one pallas_call (time grid with
        # in-kernel history gather/write-back DMA) would amortize per-step
        # dispatch; one step per call is kept to preserve the module interface.
        self.h_history, h, y = _forward_step(
            self.kernel_params, self.h_history, x, idx, self.backward_jumps,
            hidden_dim=self.hidden_dim, m=self.m)
        self.current_calculating_index += 1
        return h, y


# ----------------------------------------------------------------------------
# Pure-JAX f32 reference for one cell step (correctness check only)
# ----------------------------------------------------------------------------
def _reference_cell(x, H, c):
    q = jnp.matmul(x, c.w_in, precision='highest') + c.b_in
    K = jnp.einsum('bmd,de->bme', H, c.w_k, precision='highest') + c.b_k
    V = jnp.einsum('bmd,de->bme', H, c.w_v, precision='highest') + c.b_v
    s = jnp.einsum('be,bme->bm', q, K, precision='highest') / c.scale_factor
    a = jax.nn.softmax(s, axis=-1)
    rs = jnp.einsum('bm,bme->be', a, V, precision='highest')
    h = jax.nn.sigmoid(q + rs)
    y = jax.nn.sigmoid(jnp.matmul(h, c.w_bl, precision='highest') + c.b_bl + h)
    return h, y


if __name__ == "__main__":
    key = jax.random.PRNGKey(0)
    k_hist, k_x1, k_x2, k_w = jax.random.split(key, 4)

    batch, input_dim, hidden_dim, m, r, hist_len = 2, 16, 32, 4, 2, 8

    h_history = jax.random.normal(k_hist, (batch, hist_len, hidden_dim), jnp.float32)
    params = dict(input_dim=input_dim, hidden_dim=hidden_dim, m=m, r=r,
                  h_history=h_history)

    cell = BinaryJumpingRNNCellPallas(params, k_w)

    x1 = jax.random.normal(k_x1, (batch, input_dim), jnp.float32)
    x2 = jax.random.normal(k_x2, (batch, input_dim), jnp.float32)

    # step 1 (reference computed before forward() mutates the history)
    H1_ref = cell.gather_history(batch)
    h1_ref, y1_ref = _reference_cell(x1, H1_ref, cell)
    h1, y1 = cell.forward(x1)

    # step 2 attends over the h written into the history by step 1
    H2_ref = cell.gather_history(batch)
    h2_ref, y2_ref = _reference_cell(x2, H2_ref, cell)
    h2, y2 = cell.forward(x2)

    jax.block_until_ready((h1, y1, h2, y2))

    assert h1.shape == (batch, hidden_dim) and y1.shape == (batch, hidden_dim)
    tol = dict(atol=1e-2, rtol=1e-2)   # bf16 MXU operands vs f32 reference
    assert bool(jnp.allclose(h1, h1_ref, **tol))
    assert bool(jnp.allclose(y1, y1_ref, **tol))
    assert bool(jnp.allclose(h2, h2_ref, **tol))
    assert bool(jnp.allclose(y2, y2_ref, **tol))

    print("KERNEL_OK")
</pallas_src>

<mosaic_0001>
module attributes {stable_mosaic.version = 11 : i64} {
  func.func @_cell_kernel(%arg0: i32, %arg1: memref<8x128xbf16, #tpu.memory_space<vmem>>, %arg2: memref<4x8x128xbf16, #tpu.memory_space<vmem>>, %arg3: memref<128x128xbf16, #tpu.memory_space<vmem>>, %arg4: memref<1x128xf32, #tpu.memory_space<vmem>>, %arg5: memref<128x256xbf16, #tpu.memory_space<vmem>>, %arg6: memref<1x256xf32, #tpu.memory_space<vmem>>, %arg7: memref<128x128xbf16, #tpu.memory_space<vmem>>, %arg8: memref<1x128xf32, #tpu.memory_space<vmem>>, %arg9: memref<8x128xf32, #tpu.memory_space<vmem>>, %arg10: memref<8x128xf32, #tpu.memory_space<vmem>>) attributes {dimension_semantics = [#tpu.dimension_semantics<parallel>], iteration_bounds = array<i64: 1>, scalar_prefetch = 0 : i64, scratch_operands = 0 : i64, tpu.core_type = #tpu.core_type<tc>, window_params = [{transform_indices = @transform_0, window_bounds = array<i64: 8, 128>}, {transform_indices = @transform_1, window_bounds = array<i64: 4, 8, 128>}, {pipeline_mode = #tpu.pipeline_mode<synchronous>, transform_indices = @transform_2, window_bounds = array<i64: 128, 128>}, {pipeline_mode = #tpu.pipeline_mode<synchronous>, transform_indices = @transform_3, window_bounds = array<i64: 1, 128>}, {pipeline_mode = #tpu.pipeline_mode<synchronous>, transform_indices = @transform_4, window_bounds = array<i64: 128, 256>}, {pipeline_mode = #tpu.pipeline_mode<synchronous>, transform_indices = @transform_5, window_bounds = array<i64: 1, 256>}, {pipeline_mode = #tpu.pipeline_mode<synchronous>, transform_indices = @transform_6, window_bounds = array<i64: 128, 128>}, {pipeline_mode = #tpu.pipeline_mode<synchronous>, transform_indices = @transform_7, window_bounds = array<i64: 1, 128>}, {transform_indices = @transform_8, window_bounds = array<i64: 8, 128>}, {transform_indices = @transform_9, window_bounds = array<i64: 8, 128>}]} {
    %c0 = arith.constant 0 : index
    %c0_0 = arith.constant 0 : index
    %0 = vector.load %arg1[%c0, %c0_0] : memref<8x128xbf16, #tpu.memory_space<vmem>>, vector<8x128xbf16>
    %c0_1 = arith.constant 0 : index
    %c0_2 = arith.constant 0 : index
    %1 = vector.load %arg3[%c0_1, %c0_2] : memref<128x128xbf16, #tpu.memory_space<vmem>>, vector<128x128xbf16>
    %cst = arith.constant dense<0.000000e+00> : vector<8x128xf32>
    %2 = tpu.matmul %0, %1, %cst {dimension_numbers = #tpu.dot_dimension_numbers<[1], [0], [0], [1], [0, 0, 1, 1], [], []>} : vector<8x128xbf16>, vector<128x128xbf16>, vector<8x128xf32> -> vector<8x128xf32>
    %c0_3 = arith.constant 0 : index
    %c0_4 = arith.constant 0 : index
    %3 = vector.load %arg4[%c0_3, %c0_4] : memref<1x128xf32, #tpu.memory_space<vmem>>, vector<1x128xf32>
    %4 = vector.broadcast %3 : vector<1x128xf32> to vector<8x128xf32>
    %5 = arith.addf %2, %4 : vector<8x128xf32>
    %c0_5 = arith.constant 0 : index
    %c0_6 = arith.constant 0 : index
    %6 = vector.load %arg5[%c0_5, %c0_6] : memref<128x256xbf16, #tpu.memory_space<vmem>>, vector<128x256xbf16>
    %c0_7 = arith.constant 0 : index
    %c0_8 = arith.constant 0 : index
    %7 = vector.load %arg6[%c0_7, %c0_8] : memref<1x256xf32, #tpu.memory_space<vmem>>, vector<1x256xf32>
    %c0_9 = arith.constant 0 : index
    %c0_10 = arith.constant 0 : index
    %c0_11 = arith.constant 0 : index
    %8 = vector.load %arg2[%c0_9, %c0_10, %c0_11] : memref<4x8x128xbf16, #tpu.memory_space<vmem>>, vector<1x8x128xbf16>
    %9 = vector.shape_cast %8 : vector<1x8x128xbf16> to vector<8x128xbf16>
    %cst_12 = arith.constant dense<0.000000e+00> : vector<8x256xf32>
    %10 = tpu.matmul %9, %6, %cst_12 {dimension_numbers = #tpu.dot_dimension_numbers<[1], [0], [0], [1], [0, 0, 1, 1], [], []>} : vector<8x128xbf16>, vector<128x256xbf16>, vector<8x256xf32> -> vector<8x256xf32>
    %11 = vector.broadcast %7 : vector<1x256xf32> to vector<8x256xf32>
    %12 = arith.addf %10, %11 : vector<8x256xf32>
    %13 = vector.extract_strided_slice %12 {offsets = [0, 0], sizes = [8, 128], strides = [1, 1]} : vector<8x256xf32> to vector<8x128xf32>
    %14 = vector.extract_strided_slice %12 {offsets = [0, 128], sizes = [8, 128], strides = [1, 1]} : vector<8x256xf32> to vector<8x128xf32>
    %15 = arith.mulf %5, %13 : vector<8x128xf32>
    %cst_13 = arith.constant dense<0.000000e+00> : vector<8xf32>
    %16 = vector.multi_reduction <add>, %15, %cst_13 [1] : vector<8x128xf32> to vector<8xf32>
    %17 = vector.shape_cast %16 : vector<8xf32> to vector<8x1xf32>
    %cst_14 = arith.constant 0.176776692 : f32
    %18 = vector.broadcast %cst_14 : f32 to vector<8x1xf32>
    %19 = arith.mulf %17, %18 : vector<8x1xf32>
    %c1 = arith.constant 1 : index
    %c0_15 = arith.constant 0 : index
    %c0_16 = arith.constant 0 : index
    %20 = vector.load %arg2[%c1, %c0_15, %c0_16] : memref<4x8x128xbf16, #tpu.memory_space<vmem>>, vector<1x8x128xbf16>
    %21 = vector.shape_cast %20 : vector<1x8x128xbf16> to vector<8x128xbf16>
    %cst_17 = arith.constant dense<0.000000e+00> : vector<8x256xf32>
    %22 = tpu.matmul %21, %6, %cst_17 {dimension_numbers = #tpu.dot_dimension_numbers<[1], [0], [0], [1], [0, 0, 1, 1], [], []>} : vector<8x128xbf16>, vector<128x256xbf16>, vector<8x256xf32> -> vector<8x256xf32>
    %23 = vector.broadcast %7 : vector<1x256xf32> to vector<8x256xf32>
    %24 = arith.addf %22, %23 : vector<8x256xf32>
    %25 = vector.extract_strided_slice %24 {offsets = [0, 0], sizes = [8, 128], strides = [1, 1]} : vector<8x256xf32> to vector<8x128xf32>
    %26 = vector.extract_strided_slice %24 {offsets = [0, 128], sizes = [8, 128], strides = [1, 1]} : vector<8x256xf32> to vector<8x128xf32>
    %27 = arith.mulf %5, %25 : vector<8x128xf32>
    %cst_18 = arith.constant dense<0.000000e+00> : vector<8xf32>
    %28 = vector.multi_reduction <add>, %27, %cst_18 [1] : vector<8x128xf32> to vector<8xf32>
    %29 = vector.shape_cast %28 : vector<8xf32> to vector<8x1xf32>
    %cst_19 = arith.constant 0.176776692 : f32
    %30 = vector.broadcast %cst_19 : f32 to vector<8x1xf32>
    %31 = arith.mulf %29, %30 : vector<8x1xf32>
    %c2 = arith.constant 2 : index
    %c0_20 = arith.constant 0 : index
    %c0_21 = arith.constant 0 : index
    %32 = vector.load %arg2[%c2, %c0_20, %c0_21] : memref<4x8x128xbf16, #tpu.memory_space<vmem>>, vector<1x8x128xbf16>
    %33 = vector.shape_cast %32 : vector<1x8x128xbf16> to vector<8x128xbf16>
    %cst_22 = arith.constant dense<0.000000e+00> : vector<8x256xf32>
    %34 = tpu.matmul %33, %6, %cst_22 {dimension_numbers = #tpu.dot_dimension_numbers<[1], [0], [0], [1], [0, 0, 1, 1], [], []>} : vector<8x128xbf16>, vector<128x256xbf16>, vector<8x256xf32> -> vector<8x256xf32>
    %35 = vector.broadcast %7 : vector<1x256xf32> to vector<8x256xf32>
    %36 = arith.addf %34, %35 : vector<8x256xf32>
    %37 = vector.extract_strided_slice %36 {offsets = [0, 0], sizes = [8, 128], strides = [1, 1]} : vector<8x256xf32> to vector<8x128xf32>
    %38 = vector.extract_strided_slice %36 {offsets = [0, 128], sizes = [8, 128], strides = [1, 1]} : vector<8x256xf32> to vector<8x128xf32>
    %39 = arith.mulf %5, %37 : vector<8x128xf32>
    %cst_23 = arith.constant dense<0.000000e+00> : vector<8xf32>
    %40 = vector.multi_reduction <add>, %39, %cst_23 [1] : vector<8x128xf32> to vector<8xf32>
    %41 = vector.shape_cast %40 : vector<8xf32> to vector<8x1xf32>
    %cst_24 = arith.constant 0.176776692 : f32
    %42 = vector.broadcast %cst_24 : f32 to vector<8x1xf32>
    %43 = arith.mulf %41, %42 : vector<8x1xf32>
    %c3 = arith.constant 3 : index
    %c0_25 = arith.constant 0 : index
    %c0_26 = arith.constant 0 : index
    %44 = vector.load %arg2[%c3, %c0_25, %c0_26] : memref<4x8x128xbf16, #tpu.memory_space<vmem>>, vector<1x8x128xbf16>
    %45 = vector.shape_cast %44 : vector<1x8x128xbf16> to vector<8x128xbf16>
    %cst_27 = arith.constant dense<0.000000e+00> : vector<8x256xf32>
    %46 = tpu.matmul %45, %6, %cst_27 {dimension_numbers = #tpu.dot_dimension_numbers<[1], [0], [0], [1], [0, 0, 1, 1], [], []>} : vector<8x128xbf16>, vector<128x256xbf16>, vector<8x256xf32> -> vector<8x256xf32>
    %47 = vector.broadcast %7 : vector<1x256xf32> to vector<8x256xf32>
    %48 = arith.addf %46, %47 : vector<8x256xf32>
    %49 = vector.extract_strided_slice %48 {offsets = [0, 0], sizes = [8, 128], strides = [1, 1]} : vector<8x256xf32> to vector<8x128xf32>
    %50 = vector.extract_strided_slice %48 {offsets = [0, 128], sizes = [8, 128], strides = [1, 1]} : vector<8x256xf32> to vector<8x128xf32>
    %51 = arith.mulf %5, %49 : vector<8x128xf32>
    %cst_28 = arith.constant dense<0.000000e+00> : vector<8xf32>
    %52 = vector.multi_reduction <add>, %51, %cst_28 [1] : vector<8x128xf32> to vector<8xf32>
    %53 = vector.shape_cast %52 : vector<8xf32> to vector<8x1xf32>
    %cst_29 = arith.constant 0.176776692 : f32
    %54 = vector.broadcast %cst_29 : f32 to vector<8x1xf32>
    %55 = arith.mulf %53, %54 : vector<8x1xf32>
    %56 = arith.maximumf %19, %31 : vector<8x1xf32>
    %57 = arith.maximumf %56, %43 : vector<8x1xf32>
    %58 = arith.maximumf %57, %55 : vector<8x1xf32>
    %59 = arith.subf %19, %58 : vector<8x1xf32>
    %60 = math.exp %59 : vector<8x1xf32>
    %61 = arith.subf %31, %58 : vector<8x1xf32>
    %62 = math.exp %61 : vector<8x1xf32>
    %63 = arith.subf %43, %58 : vector<8x1xf32>
    %64 = math.exp %63 : vector<8x1xf32>
    %65 = arith.subf %55, %58 : vector<8x1xf32>
    %66 = math.exp %65 : vector<8x1xf32>
    %67 = arith.addf %60, %62 : vector<8x1xf32>
    %68 = arith.addf %67, %64 : vector<8x1xf32>
    %69 = arith.addf %68, %66 : vector<8x1xf32>
    %70 = tpu.reciprocal %69 {approx = true} : vector<8x1xf32> -> vector<8x1xf32>
    %71 = arith.mulf %60, %70 : vector<8x1xf32>
    %72 = vector.broadcast %71 : vector<8x1xf32> to vector<8x128xf32>
    %73 = arith.mulf %72, %14 : vector<8x128xf32>
    %74 = arith.mulf %62, %70 : vector<8x1xf32>
    %75 = vector.broadcast %74 : vector<8x1xf32> to vector<8x128xf32>
    %76 = arith.mulf %75, %26 : vector<8x128xf32>
    %77 = arith.addf %73, %76 : vector<8x128xf32>
    %78 = arith.mulf %64, %70 : vector<8x1xf32>
    %79 = vector.broadcast %78 : vector<8x1xf32> to vector<8x128xf32>
    %80 = arith.mulf %79, %38 : vector<8x128xf32>
    %81 = arith.addf %77, %80 : vector<8x128xf32>
    %82 = arith.mulf %66, %70 : vector<8x1xf32>
    %83 = vector.broadcast %82 : vector<8x1xf32> to vector<8x128xf32>
    %84 = arith.mulf %83, %50 : vector<8x128xf32>
    %85 = arith.addf %81, %84 : vector<8x128xf32>
    %86 = arith.addf %5, %85 : vector<8x128xf32>
    %87 = arith.negf %86 : vector<8x128xf32>
    %88 = math.exp %87 : vector<8x128xf32>
    %cst_30 = arith.constant 1.000000e+00 : f32
    %89 = vector.broadcast %cst_30 : f32 to vector<8x128xf32>
    %90 = arith.addf %89, %88 : vector<8x128xf32>
    %91 = arith.divf %89, %90 : vector<8x128xf32>
    %92 = arith.truncf %91 : vector<8x128xf32> to vector<8x128xbf16>
    %c0_31 = arith.constant 0 : index
    %c0_32 = arith.constant 0 : index
    %93 = vector.load %arg7[%c0_31, %c0_32] : memref<128x128xbf16, #tpu.memory_space<vmem>>, vector<128x128xbf16>
    %cst_33 = arith.constant dense<0.000000e+00> : vector<8x128xf32>
    %94 = tpu.matmul %92, %93, %cst_33 {dimension_numbers = #tpu.dot_dimension_numbers<[1], [0], [0], [1], [0, 0, 1, 1], [], []>} : vector<8x128xbf16>, vector<128x128xbf16>, vector<8x128xf32> -> vector<8x128xf32>
    %c0_34 = arith.constant 0 : index
    %c0_35 = arith.constant 0 : index
    %95 = vector.load %arg8[%c0_34, %c0_35] : memref<1x128xf32, #tpu.memory_space<vmem>>, vector<1x128xf32>
    %96 = vector.broadcast %95 : vector<1x128xf32> to vector<8x128xf32>
    %97 = arith.addf %94, %96 : vector<8x128xf32>
    %98 = arith.addf %97, %91 : vector<8x128xf32>
    %99 = arith.negf %98 : vector<8x128xf32>
    %100 = math.exp %99 : vector<8x128xf32>
    %cst_36 = arith.constant 1.000000e+00 : f32
    %101 = vector.broadcast %cst_36 : f32 to vector<8x128xf32>
    %102 = arith.addf %101, %100 : vector<8x128xf32>
    %103 = arith.divf %101, %102 : vector<8x128xf32>
    %c0_37 = arith.constant 0 : index
    %c0_38 = arith.constant 0 : index
    %104 = vector.load %arg9[%c0_37, %c0_38] : memref<8x128xf32, #tpu.memory_space<vmem>>, vector<8x128xf32>
    tpu.vector_store %arg9[%c0_37, %c0_38], %91 {strides = array<i32>} : memref<8x128xf32, #tpu.memory_space<vmem>>, vector<8x128xf32>,
    %c0_39 = arith.constant 0 : index
    %c0_40 = arith.constant 0 : index
    %105 = vector.load %arg10[%c0_39, %c0_40] : memref<8x128xf32, #tpu.memory_space<vmem>>, vector<8x128xf32>
    tpu.vector_store %arg10[%c0_39, %c0_40], %103 {strides = array<i32>} : memref<8x128xf32, #tpu.memory_space<vmem>>, vector<8x128xf32>,
    return
  }
  func.func @transform_0(%arg0: i32) -> (i32, i32) {
    %c0_i32 = arith.constant 0 : i32
    %c0_i32_0 = arith.constant 0 : i32
    return %arg0, %c0_i32 : i32, i32
  }
  func.func @transform_1(%arg0: i32) -> (i32, i32, i32) {
    %c0_i32 = arith.constant 0 : i32
    %c0_i32_0 = arith.constant 0 : i32
    %c0_i32_1 = arith.constant 0 : i32
    return %c0_i32, %arg0, %c0_i32_0 : i32, i32, i32
  }
  func.func @transform_2(%arg0: i32) -> (i32, i32) {
    %c0_i32 = arith.constant 0 : i32
    %c0_i32_0 = arith.constant 0 : i32
    %c0_i32_1 = arith.constant 0 : i32
    return %c0_i32, %c0_i32_0 : i32, i32
  }
  func.func @transform_3(%arg0: i32) -> (i32, i32) {
    %c0_i32 = arith.constant 0 : i32
    %c0_i32_0 = arith.constant 0 : i32
    %c0_i32_1 = arith.constant 0 : i32
    return %c0_i32, %c0_i32_0 : i32, i32
  }
  func.func @transform_4(%arg0: i32) -> (i32, i32) {
    %c0_i32 = arith.constant 0 : i32
    %c0_i32_0 = arith.constant 0 : i32
    %c0_i32_1 = arith.constant 0 : i32
    return %c0_i32, %c0_i32_0 : i32, i32
  }
  func.func @transform_5(%arg0: i32) -> (i32, i32) {
    %c0_i32 = arith.constant 0 : i32
    %c0_i32_0 = arith.constant 0 : i32
    %c0_i32_1 = arith.constant 0 : i32
    return %c0_i32, %c0_i32_0 : i32, i32
  }
  func.func @transform_6(%arg0: i32) -> (i32, i32) {
    %c0_i32 = arith.constant 0 : i32
    %c0_i32_0 = arith.constant 0 : i32
    %c0_i32_1 = arith.constant 0 : i32
    return %c0_i32, %c0_i32_0 : i32, i32
  }
  func.func @transform_7(%arg0: i32) -> (i32, i32) {
    %c0_i32 = arith.constant 0 : i32
    %c0_i32_0 = arith.constant 0 : i32
    %c0_i32_1 = arith.constant 0 : i32
    return %c0_i32, %c0_i32_0 : i32, i32
  }
  func.func @transform_8(%arg0: i32) -> (i32, i32) {
    %c0_i32 = arith.constant 0 : i32
    %c0_i32_0 = arith.constant 0 : i32
    return %arg0, %c0_i32 : i32, i32
  }
  func.func @transform_9(%arg0: i32) -> (i32, i32) {
    %c0_i32 = arith.constant 0 : i32
    %c0_i32_0 = arith.constant 0 : i32
    return %arg0, %c0_i32 : i32, i32
  }
}

</mosaic_0001>

<bundles_post_ra>
// kernel: _forward_step.1
= control target key start
LH: loop header
LB: loop body
LE: loop exit
PB: predicated region body
PF: predicated region fallthrough
CT: control target
= control target key end

     0   :  { %15 = vsyncpa [#allocation3], 0  ;;  %s1123_s0 = inlined_call_operand.vmem [shape: bf16[8,128], index: 0, kind: input, shape index: {}]   ;;  %s1124_s1 = inlined_call_operand.vmem [shape: bf16[4,8,128], index: 1, kind: input, shape index: {}]   ;;  %s1125_s2 = inlined_call_operand.vmem [shape: bf16[128,128], index: 2, kind: input, shape index: {}]   ;;  %s1126_s3 = inlined_call_operand.vmem [shape: f32[1,128], index: 3, kind: input, shape index: {}]   ;;  %s1127_s4 = inlined_call_operand.hbm [shape: bf16[128,256], index: 4, kind: input, shape index: {}]   ;;  %s1128_s5 = inlined_call_operand.vmem [shape: f32[1,256], index: 5, kind: input, shape index: {}]   ;;  %s1129_s6 = inlined_call_operand.hbm [shape: bf16[128,128], index: 6, kind: input, shape index: {}]   ;;  %s1130_s7 = inlined_call_operand.vmem [shape: f32[1,128], index: 7, kind: input, shape index: {}]   ;;  %s1131_s8 = inlined_call_operand.vmem [shape: f32[8,128], index: 8, kind: output, shape index: {0}]   ;;  %s1132_s9 = inlined_call_operand.vmem [shape: f32[8,128], index: 9, kind: output, shape index: {1}]  }
   0x1   :  { %16 = vsyncpa [#allocation5], 0  ;;  %s847_s30 = smov [#allocation2]   ;;  %s799_s13 = scalar_lea.hbm %s1127_s4, 2048 }
   0x2   :  { %s30_s10 = sshll.u32 %s847_s30, 4  ;;  %p800_p0 = scmp.ne.s32.totalorder %s1127_s4, %s799_s13  ;;  %s31_s10 = int_to_ptr.vmem [resolvable:$true] %s30_s10 }
   0x3   :  { %p803_p1 = scmp.lt.u32.totalorder %s799_s13, %s1127_s4 }
   0x5   :  { %p805_p2 = pnand %p803_p1, %p800_p0 }
   0x7   :  { %808 = shalt.err (!%p805_p2)
}
   0x8   :  { %s809_s18 = scalar_lea.vmem %s31_s10, 2048  ;;  %p814_p4 = scmp.lt.s32.totalorder %s31_s10, %s31_s10 }
   0x9   :  { %p810_p3 = scmp.ne.s32.totalorder %s31_s10, %s809_s18  ;;  %p815_p5 = scmp.lt.s32.totalorder %s809_s18, %s809_s18 }
   0xb   :  { %p816_p6 = por %p815_p5, %p814_p4 }
   0xd   :  { %p817_p7 = pnand %p816_p6, %p810_p3 }
   0xf   :  { %820 = shalt.err (!%p817_p7)
}
  0x10   :  { %s848_s19 = smov 128   ;;  %s849_s20 = smov 8  }
  0x11   :  { %36 = dma.hbm_to_vmem [thread:$0]  %s1127_s4, 2048, %s31_s10, [#allocation3], %s848_s19, %s848_s19, %s849_s20  }
  0x12   :  { %s850_s23 = smov [#allocation4]   ;;  %s821_s27 = scalar_lea.hbm %s1129_s6, 1024 }
  0x13   :  { %s44_s24 = sshll.u32 %s850_s23, 4  ;;  %p822_p8 = scmp.ne.s32.totalorder %s1129_s6, %s821_s27  ;;  %s45_s24 = int_to_ptr.vmem [resolvable:$true] %s44_s24 }
  0x14   :  { %p825_p9 = scmp.lt.u32.totalorder %s821_s27, %s1129_s6 }
  0x16   :  { %p827_p10 = pnand %p825_p9, %p822_p8 }
  0x18   :  { %830 = shalt.err (!%p827_p10)
}
  0x19   :  { %s831_s12 = scalar_lea.vmem %s45_s24, 1024  ;;  %p836_p12 = scmp.lt.s32.totalorder %s45_s24, %s45_s24 }
  0x1a   :  { %p832_p11 = scmp.ne.s32.totalorder %s45_s24, %s831_s12  ;;  %p837_p13 = scmp.lt.s32.totalorder %s831_s12, %s831_s12 }
  0x1c   :  { %p838_p0 = por %p837_p13, %p836_p12 }
  0x1e   :  { %p839_p1 = pnand %p838_p0, %p832_p11 }
  0x20   :  { %842 = shalt.err (!%p839_p1)
}
  0x21   :  { %s851_s4 = smov 64   ;;  %s852_s10 = smov 4  }
  0x22   :  { %50 = dma.hbm_to_vmem [thread:$0]  %s1129_s6, 1024, %s45_s24, [#allocation5], %s851_s4, %s851_s4, %s852_s10  }
  0x23   :  { %843 = dma.done.wait [#allocation3], 2048  }
  0x24   :  { %844 = vsyncadd [#allocation3], 4294965248 }
  0x25   :  { %845 = dma.done.wait [#allocation5], 1024  }
  0x26   :  { %846 = vsyncadd [#allocation5], 4294966272  ;;  %v853_v0 = vmov 0.0   ;;  %vm854_vm0 = vmmov 0   ;;  %v855_v1 = vmov 0   ;;  %v741_v2 = vld [vmem:[%s1125_s2] sm:$0xff]   ;;  %v191_v31 = vlaneseq }
  0x27   :  { %692 = vmatprep.subr.bf16.mxu0 %v853_v0  ;;  %708 = vmatprep.mubr.msk.bf16.mxu0 %vm854_vm0, %v853_v0  ;;  %v937_v3 = vld [vmem:[#allocation2 + $0x4] ss:$8 sps:$4 sm:$0xff]   ;;  %v939_v4 = vld [vmem:[#allocation2] ss:$8 sps:$4 sm:$0xff]   ;;  %v947_v6 = vld [vmem:[#allocation2 + $0x14] ss:$8 sps:$4 sm:$0xff]  }
  0x28   :  { %313 = vmatprep.mubr.bf16.mxu1 %v855_v1  ;;  %693 = vmatpush3.bf16.msra.mxu0 %v741_v2  ;;  %v745_v5 = vld [vmem:[%s1125_s2 + $0x8] sm:$0xff]   ;;  %v949_v7 = vld [vmem:[#allocation2 + $0x10] ss:$8 sps:$4 sm:$0xff]   ;;  %v962_v11 = vld [vmem:[#allocation2 + $0x34] ss:$8 sps:$4 sm:$0xff]   ;;  %v192_v32 = vshrl.u32 %v191_v31, 7 }
  0x29   :  { %281 = vmatprep.subr.bf16.mxu1 %v937_v3  ;;  %694 = vmatprep.subr.bf16.mxu0 %v853_v0  ;;  %v749_v8 = vld [vmem:[%s1125_s2 + $0x10] sm:$0xff]   ;;  %v955_v9 = vld [vmem:[#allocation2 + $0x24] ss:$8 sps:$4 sm:$0xff]   ;;  %v959_v10 = vld [vmem:[#allocation2 + $0x20] ss:$8 sps:$4 sm:$0xff]  }
  0x2a   :  { %282 = vmatpush1.bf16.msra.mxu1 %v939_v4  ;;  %v753_v12 = vld [vmem:[%s1125_s2 + $0x18] sm:$0xff]   ;;  %v972_v14 = vld [vmem:[#allocation2 + $0x44] ss:$8 sps:$4 sm:$0xff]   ;;  %v979_v16 = vld [vmem:[#allocation2 + $0x40] ss:$8 sps:$4 sm:$0xff]   ;;  %v197_v33 = vsub.s32 1, %v192_v32 }
  0x2b   :  { %283 = vmatprep.subr.bf16.mxu1 %v947_v6  ;;  %v969_v13 = vld [vmem:[#allocation2 + $0x30] ss:$8 sps:$4 sm:$0xff]   ;;  %v757_v15 = vld [vmem:[%s1125_s2 + $0x20] sm:$0xff]   ;;  %v982_v17 = vld [vmem:[#allocation2 + $0x54] ss:$8 sps:$4 sm:$0xff]   ;;  %v193_v36 = vsub.s32 0, %v192_v32 }
  0x2c   :  { %695 = vmatpush3.bf16.msra.mxu0 %v745_v5  ;;  %v761_v18 = vld [vmem:[%s1125_s2 + $0x28] sm:$0xff]   ;;  %v988_v19 = vld [vmem:[#allocation2 + $0x50] ss:$8 sps:$4 sm:$0xff]   ;;  %v1000_v23 = vld [vmem:[#allocation2 + $0x74] ss:$8 sps:$4 sm:$0xff]  }
  0x2d   :  { %696 = vmatprep.subr.bf16.mxu0 %v853_v0  ;;  %v765_v20 = vld [vmem:[%s1125_s2 + $0x30] sm:$0xff]   ;;  %v994_v21 = vld [vmem:[#allocation2 + $0x64] ss:$8 sps:$4 sm:$0xff]   ;;  %v997_v22 = vld [vmem:[#allocation2 + $0x60] ss:$8 sps:$4 sm:$0xff]  }
  0x2e   :  { %284 = vmatpush1.bf16.msra.mxu1 %v949_v7  ;;  %v769_v24 = vld [vmem:[%s1125_s2 + $0x38] sm:$0xff]   ;;  %v60_v26 = vld [vmem:[%s1123_s0] sm:$0xf]  ;;  %v660_v28 = vld [vmem:[%s1124_s1 + $0x4] sm:$0xf] }
  0x2f   :  { %285 = vmatprep.subr.bf16.mxu1 %v955_v9  ;;  %v1009_v25 = vld [vmem:[#allocation2 + $0x70] ss:$8 sps:$4 sm:$0xff]   ;;  %v189_v27 = vld [vmem:[%s1124_s1] sm:$0xf]  ;;  %v661_v29 = vld [vmem:[%s1124_s1 + $0x8] sm:$0xf] }
  0x30   :  { %697 = vmatpush3.bf16.msra.mxu0 %v749_v8  ;;  %v662_v30 = vld [vmem:[%s1124_s1 + $0xc] sm:$0xf]  ;;  %v188_v34 = vld [vmem:[%s1128_s5] sm:$0x3] }
  0x31   :  { %698 = vmatprep.subr.bf16.mxu0 %v853_v0  ;;  %v198_v35 = vrot.slane %v188_v34, %v197_v33  ;;  %v635_v37 = vld [vmem:[%s1126_s3] ss:$0 sm:$0xff]  ;;  %v194_v38 = vrot.slane %v188_v34, %v193_v36 }
  0x32   :  { %286 = vmatpush1.bf16.msra.mxu1 %v959_v10 }
  0x33   :  { %287 = vmatprep.subr.bf16.mxu1 %v962_v11 }
  0x34   :  { %699 = vmatpush3.bf16.msra.mxu0 %v753_v12  ;;  %v776_v12 = vld [vmem:[#allocation4 + $0x18] sm:$0xff]  }
  0x35   :  { %700 = vmatprep.subr.bf16.mxu0 %v853_v0 }
  0x36   :  { %288 = vmatpush1.bf16.msra.mxu1 %v969_v13 }
  0x37   :  { %289 = vmatprep.subr.bf16.mxu1 %v972_v14 }
  0x38   :  { %701 = vmatpush3.bf16.msra.mxu0 %v757_v15  ;;  %v779_v15 = vld [vmem:[#allocation4 + $0x30] sm:$0xff]  }
  0x39   :  { %702 = vmatprep.subr.bf16.mxu0 %v853_v0 }
  0x3a   :  { %290 = vmatpush1.bf16.msra.mxu1 %v979_v16 }
  0x3b   :  { %291 = vmatprep.subr.bf16.mxu1 %v982_v17 }
  0x3c   :  { %703 = vmatpush3.bf16.msra.mxu0 %v761_v18 }
  0x3d   :  { %704 = vmatprep.subr.bf16.mxu0 %v853_v0 }
  0x3e   :  { %292 = vmatpush1.bf16.msra.mxu1 %v988_v19 }
  0x3f   :  { %293 = vmatprep.subr.bf16.mxu1 %v994_v21 }
  0x40   :  { %705 = vmatpush3.bf16.msra.mxu0 %v765_v20 }
  0x41   :  { %706 = vmatprep.subr.bf16.mxu0 %v853_v0 }
  0x42   :  { %294 = vmatpush1.bf16.msra.mxu1 %v997_v22 }
  0x43   :  { %295 = vmatprep.subr.bf16.mxu1 %v1000_v23 }
  0x44   :  { %707 = vmatpush3.bf16.msra.mxu0 %v769_v24 }
  0x45   :  { %328 = vmatprep.subr.bf16.mxu0 %v937_v3 }
  0x46   :  { %296 = vmatpush1.bf16.msra.mxu1 %v1009_v25 }
  0x47   :  { %709 = vmatmul.mubr.bf16.vlgmr.msra.gmra.mrb[0].mxu0 %v60_v26  ;;  %375 = vmatprep.subr.bf16.mxu1 %v937_v3 }
  0x48   :  { %329 = vmatpush1.bf16.msra.mxu0 %v939_v4  ;;  %360 = vmatprep.mubr.bf16.mxu0 %v855_v1 }
  0x49   :  { %314 = vmatmul.mubr.bf16.vlgmr.msra.gmra.mrb[0].mxu1 %v189_v27  ;;  %330 = vmatprep.subr.bf16.mxu0 %v947_v6 }
  0x4a   :  { %376 = vmatpush1.bf16.msra.mxu1 %v939_v4  ;;  %407 = vmatprep.mubr.bf16.mxu1 %v855_v1 }
  0x4b   :  { %377 = vmatprep.subr.bf16.mxu1 %v947_v6 }
  0x4c   :  { %331 = vmatpush1.bf16.msra.mxu0 %v949_v7 }
  0x4d   :  { %332 = vmatprep.subr.bf16.mxu0 %v955_v9 }
  0x4e   :  { %378 = vmatpush1.bf16.msra.mxu1 %v949_v7 }
  0x4f   :  { %379 = vmatprep.subr.bf16.mxu1 %v955_v9 }
  0x50   :  { %333 = vmatpush1.bf16.msra.mxu0 %v959_v10 }
  0x51   :  { %334 = vmatprep.subr.bf16.mxu0 %v962_v11 }
  0x52   :  { %380 = vmatpush1.bf16.msra.mxu1 %v959_v10 }
  0x53   :  { %381 = vmatprep.subr.bf16.mxu1 %v962_v11 }
  0x54   :  { %335 = vmatpush1.bf16.msra.mxu0 %v969_v13 }
  0x55   :  { %336 = vmatprep.subr.bf16.mxu0 %v972_v14 }
  0x56   :  { %382 = vmatpush1.bf16.msra.mxu1 %v969_v13 }
  0x57   :  { %383 = vmatprep.subr.bf16.mxu1 %v972_v14 }
  0x58   :  { %337 = vmatpush1.bf16.msra.mxu0 %v979_v16 }
  0x59   :  { %338 = vmatprep.subr.bf16.mxu0 %v982_v17 }
  0x5a   :  { %384 = vmatpush1.bf16.msra.mxu1 %v979_v16 }
  0x5b   :  { %385 = vmatprep.subr.bf16.mxu1 %v982_v17 }
  0x5c   :  { %339 = vmatpush1.bf16.msra.mxu0 %v988_v19 }
  0x5d   :  { %340 = vmatprep.subr.bf16.mxu0 %v994_v21 }
  0x5e   :  { %386 = vmatpush1.bf16.msra.mxu1 %v988_v19 }
  0x5f   :  { %387 = vmatprep.subr.bf16.mxu1 %v994_v21 }
  0x60   :  { %341 = vmatpush1.bf16.msra.mxu0 %v997_v22 }
  0x61   :  { %342 = vmatprep.subr.bf16.mxu0 %v1000_v23 }
  0x62   :  { %388 = vmatpush1.bf16.msra.mxu1 %v997_v22 }
  0x63   :  { %389 = vmatprep.subr.bf16.mxu1 %v1000_v23 }
  0x64   :  { %343 = vmatpush1.bf16.msra.mxu0 %v1009_v25 }
  0x65   :  { %422 = vmatprep.subr.bf16.mxu0 %v937_v3 }
  0x66   :  { %390 = vmatpush1.bf16.msra.mxu1 %v1009_v25 }
  0x67   :  { %361 = vmatmul.mubr.bf16.vlgmr.msra.gmra.mrb[4].mxu0 %v660_v28  ;;  %712 = vmatprep.subr.bf16.mxu1 %v853_v0 }
  0x68   :  { %423 = vmatpush1.bf16.msra.mxu0 %v939_v4  ;;  %454 = vmatprep.mubr.bf16.mxu0 %v855_v1 }
  0x69   :  { %408 = vmatmul.mubr.bf16.vlgmr.msra.gmra.mrb[4].mxu1 %v661_v29  ;;  %424 = vmatprep.subr.bf16.mxu0 %v947_v6 }
  0x6a   :  { %728 = vmatprep.mubr.msk.bf16.mxu1 %vm854_vm0, %v853_v0 }
  0x6c   :  { %425 = vmatpush1.bf16.msra.mxu0 %v949_v7 }
  0x6d   :  { %426 = vmatprep.subr.bf16.mxu0 %v955_v9  ;;  %v773_v9 = vld [vmem:[#allocation4] sm:$0xff]  }
  0x6e   :  { %713 = vmatpush3.bf16.msra.mxu1 %v773_v9 }
  0x6f   :  { %714 = vmatprep.subr.bf16.mxu1 %v853_v0 }
  0x70   :  { %427 = vmatpush1.bf16.msra.mxu0 %v959_v10  ;;  %v774_v10 = vld [vmem:[#allocation4 + $0x8] sm:$0xff]  }
  0x71   :  { %428 = vmatprep.subr.bf16.mxu0 %v962_v11  ;;  %v775_v11 = vld [vmem:[#allocation4 + $0x10] sm:$0xff]  }
  0x72   :  { %715 = vmatpush3.bf16.msra.mxu1 %v774_v10 }
  0x73   :  { %716 = vmatprep.subr.bf16.mxu1 %v853_v0 }
  0x74   :  { %429 = vmatpush1.bf16.msra.mxu0 %v969_v13  ;;  %v777_v13 = vld [vmem:[#allocation4 + $0x20] sm:$0xff]  }
  0x75   :  { %430 = vmatprep.subr.bf16.mxu0 %v972_v14  ;;  %v778_v14 = vld [vmem:[#allocation4 + $0x28] sm:$0xff]  }
  0x76   :  { %717 = vmatpush3.bf16.msra.mxu1 %v775_v11 }
  0x77   :  { %718 = vmatprep.subr.bf16.mxu1 %v853_v0 }
  0x78   :  { %431 = vmatpush1.bf16.msra.mxu0 %v979_v16  ;;  %v780_v16 = vld [vmem:[#allocation4 + $0x38] sm:$0xff]  }
  0x79   :  { %432 = vmatprep.subr.bf16.mxu0 %v982_v17 }
  0x7a   :  { %719 = vmatpush3.bf16.msra.mxu1 %v776_v12 }
  0x7b   :  { %720 = vmatprep.subr.bf16.mxu1 %v853_v0 }
  0x7c   :  { %433 = vmatpush1.bf16.msra.mxu0 %v988_v19 }
  0x7d   :  { %434 = vmatprep.subr.bf16.mxu0 %v994_v21 }
  0x7e   :  { %721 = vmatpush3.bf16.msra.mxu1 %v777_v13 }
  0x7f   :  { %722 = vmatprep.subr.bf16.mxu1 %v853_v0 }
  0x80   :  { %435 = vmatpush1.bf16.msra.mxu0 %v997_v22 }
  0x81   :  { %436 = vmatprep.subr.bf16.mxu0 %v1000_v23 }
  0x82   :  { %723 = vmatpush3.bf16.msra.mxu1 %v778_v14 }
  0x83   :  { %724 = vmatprep.subr.bf16.mxu1 %v853_v0 }
  0x84   :  { %437 = vmatpush1.bf16.msra.mxu0 %v1009_v25 }
  0x86   :  { %725 = vmatpush3.bf16.msra.mxu1 %v779_v15 }
  0x87   :  { %455 = vmatmul.mubr.bf16.vlgmr.msra.gmra.mrb[8].mxu0 %v662_v30  ;;  %726 = vmatprep.subr.bf16.mxu1 %v853_v0 }
  0x8a   :  { %727 = vmatpush3.bf16.msra.mxu1 %v780_v16 }
 0x11a   :  { %v166_v39 = vpop.f32.mrb[0].mxu0 }
 0x11b   :  { %v1088_v40 = vadd.f32 %v635_v37, %v166_v39  ;;  %v710_v41 = vpop.f32.mrb[1].mxu0 }
 0x11c   :  { %v315_v42 = vpop.f32.mrb[0].mxu1  ;;  %v169_v43 = vpop.f32.mrb[2].mxu0 }
 0x11d   :  { %v316_v44 = vadd.f32 %v315_v42, %v194_v38  ;;  %v711_v45 = vpop.f32.mrb[3].mxu0  ;;  %v317_v46 = vpop.f32.mrb[1].mxu1 }
 0x11e   :  { %v1090_v47 = vadd.f32 %v317_v46, %v198_v35  ;;  %v319_v48 = vpop.f32.mrb[2].mxu1 }
 0x11f   :  { %v322_v49 = vmul.f32 %v316_v44, %v1088_v40  ;;  %v320_v50 = vpop.f32.mrb[3].mxu1 }
 0x121   :  { %323 = vadd.xlane.f32.xlu0 %v322_v49 }
 0x13a   :  { %v362_v51 = vpop.f32.mrb[4].mxu0 }
 0x13b   :  { %v363_v52 = vadd.f32 %v362_v51, %v194_v38  ;;  %v364_v53 = vpop.f32.mrb[5].mxu0 }
 0x13c   :  { %v1093_v54 = vadd.f32 %v364_v53, %v198_v35  ;;  %v409_v55 = vpop.f32.mrb[4].mxu1  ;;  %v366_v56 = vpop.f32.mrb[6].mxu0 }
 0x13d   :  { %v410_v57 = vadd.f32 %v409_v55, %v194_v38  ;;  %v367_v58 = vpop.f32.mrb[7].mxu0  ;;  %v369_v59 = vmul.f32 %v363_v52, %v1088_v40  ;;  %v411_v60 = vpop.f32.mrb[5].mxu1 }
 0x13e   :  { %v1096_v61 = vadd.f32 %v411_v60, %v198_v35  ;;  %v413_v62 = vpop.f32.mrb[6].mxu1 }
 0x13f   :  { %370 = vadd.xlane.f32.xlu0 %v369_v59  ;;  %v416_v63 = vmul.f32 %v410_v57, %v1088_v40  ;;  %v414_v1 = vpop.f32.mrb[7].mxu1 }
 0x141   :  { %417 = vadd.xlane.f32.xlu1 %v416_v63 }
 0x15a   :  { %v456_v2 = vpop.f32.mrb[8].mxu0 }
 0x15b   :  { %v457_v3 = vadd.f32 %v456_v2, %v194_v38  ;;  %v458_v4 = vpop.f32.mrb[9].mxu0 }
 0x15c   :  { %v1099_v5 = vadd.f32 %v458_v4, %v198_v35  ;;  %v460_v6 = vpop.f32.mrb[10].mxu0 }
 0x15d   :  { %v461_v7 = vpop.f32.mrb[11].mxu0  ;;  %v463_v8 = vmul.f32 %v457_v3, %v1088_v40 }
 0x15f   :  { %464 = vadd.xlane.f32.xlu1 %v463_v8 }
 0x1ae   :  { %v324_v17 = vpop.xlane.xlu0 %323 }
 0x1af   :  { %v325_v21 = vmul.f32 0.17677669, %v324_v17 }
 0x1cc   :  { %v371_v18 = vpop.xlane.xlu0 %370 }
 0x1cd   :  { %v372_v19 = vmul.f32 0.17677669, %v371_v18 }
 0x1ce   :  { %v418_v20 = vpop.xlane.xlu1 %417 }
 0x1cf   :  { %v467_v22 = vmax.f32 %v325_v21, %v372_v19  ;;  %v419_v23 = vmul.f32 0.17677669, %v418_v20 }
 0x1d1   :  { %v468_v25 = vmax.f32 %v467_v22, %v419_v23 }
 0x1ec   :  { %v465_v24 = vpop.xlane.xlu1 %464 }
 0x1ed   :  { %v466_v26 = vmul.f32 0.17677669, %v465_v24 }
 0x1ef   :  { %v469_v27 = vmax.f32 %v468_v25, %v466_v26 }
 0x1f1   :  { %v470_v28 = vsub.f32 %v325_v21, %v469_v27  ;;  %v473_v29 = vsub.f32 %v372_v19, %v469_v27  ;;  %v476_v30 = vsub.f32 %v419_v23, %v469_v27  ;;  %v479_v31 = vsub.f32 %v466_v26, %v469_v27 }
 0x1f3   :  { %v471_v32 = vmul.f32 1.442695, %v470_v28  ;;  %v474_v33 = vmul.f32 1.442695, %v473_v29  ;;  %v477_v0 = vmul.f32 1.442695, %v476_v30 }
 0x1f4   :  { %v480_v34 = vmul.f32 1.442695, %v479_v31 }
 0x1f5   :  { %781 = vpow2.f32 %v471_v32 }
 0x1f6   :  { %783 = vpow2.f32 %v474_v33 }
 0x1f7   :  { %785 = vpow2.f32 %v477_v0 }
 0x1f8   :  { %787 = vpow2.f32 %v480_v34 }
 0x1ff   :  { %v782_v35 = vpop.eup %781 }
 0x200   :  { %v784_v36 = vpop.eup %783 }
 0x201   :  { %v482_v37 = vadd.f32 %v784_v36, %v782_v35  ;;  %v786_v38 = vpop.eup %785 }
 0x202   :  { %v788_v41 = vpop.eup %787 }
 0x203   :  { %v483_v39 = vadd.f32 %v786_v38, %v482_v37 }
 0x205   :  { %v484_v42 = vadd.f32 %v788_v41, %v483_v39 }
 0x207   :  { %789 = vrcp.f32 %v484_v42 }
 0x211   :  { %v790_v43 = vpop.eup %789 }
 0x212   :  { %v486_v44 = vmul.f32 %v790_v43, %v782_v35  ;;  %v488_v45 = vmul.f32 %v790_v43, %v784_v36  ;;  %v491_v46 = vmul.f32 %v790_v43, %v786_v38  ;;  %v494_v50 = vmul.f32 %v790_v43, %v788_v41 }
 0x214   :  { %v487_v48 = vmul.f32 %v486_v44, %v1090_v47  ;;  %v489_v49 = vmul.f32 %v488_v45, %v1093_v54  ;;  %v492_v52 = vmul.f32 %v491_v46, %v1096_v61  ;;  %v495_v55 = vmul.f32 %v494_v50, %v1099_v5  ;;  %v664_v54 = vld [vmem:[%s1130_s7] ss:$0 sm:$0xff] }
 0x216   :  { %v490_v51 = vadd.f32 %v489_v49, %v487_v48 }
 0x218   :  { %v493_v53 = vadd.f32 %v492_v52, %v490_v51 }
 0x21a   :  { %v496_v56 = vadd.f32 %v495_v55, %v493_v53 }
 0x21c   :  { %v497_v57 = vadd.f32 %v496_v56, %v1088_v40 }
 0x21e   :  { %v663_v58 = vmul.f32 -1.442695, %v497_v57 }
 0x220   :  { %791 = vpow2.f32 %v663_v58 }
 0x22a   :  { %v792_v59 = vpop.eup %791 }
 0x22b   :  { %v501_v60 = vadd.f32 1.0, %v792_v59 }
 0x22d   :  { %793 = vrcp.f32 %v501_v60 }
 0x237   :  { %v794_v62 = vpop.eup %793 }
 0x238   :  { %623 = vst [vmem:[%s1131_s8] sm:$0xff] %v794_v62  ;;  %v504_v47 = vpack.c.bf16 %v794_v62, %v794_v62 }
 0x23a   :  { %729 = vmatmul.mubr.bf16.vlgmr.msra.gmra.mrb[8].mxu1 %v504_v47 }
 0x30d   :  { %v610_v61 = vpop.f32.mrb[8].mxu1 }
 0x30e   :  { %v611_v63 = vadd.f32 %v664_v54, %v610_v61  ;;  %v730_v1 = vpop.f32.mrb[9].mxu1 }
 0x30f   :  { %v613_v40 = vpop.f32.mrb[10].mxu1 }
 0x310   :  { %v616_v2 = vadd.f32 %v794_v62, %v611_v63  ;;  %v731_v3 = vpop.f32.mrb[11].mxu1 }
 0x312   :  { %v673_v4 = vmul.f32 -1.442695, %v616_v2 }
 0x314   :  { %795 = vpow2.f32 %v673_v4 }
 0x31e   :  { %v796_v5 = vpop.eup %795 }
 0x31f   :  { %v620_v6 = vadd.f32 1.0, %v796_v5 }
 0x321   :  { %797 = vrcp.f32 %v620_v6 }
 0x32b   :  { %v798_v7 = vpop.eup %797 }
 0x32c   :  { %624 = vst [vmem:[%s1132_s9] sm:$0xff] %v798_v7 }
 0x32d   :  { %633 = vsyncpa [#allocation3], 1 }
 0x32e   :  { %634 = vsyncpa [#allocation5], 1 }

</bundles_post_ra>
